<compile_context>
chip_gen: v7x
topology: tpu7x:2x2x1
jax: 0.10.0
libtpu: 0.0.40
codegen_flags: <defaults>
</compile_context>

<pallas_src>
import jax
import jax.numpy as jnp
from jax.experimental import pallas as pl
from jax.experimental.pallas import tpu as pltpu


def _l_structure_kernel(org_ref, enh_ref, pht_ref, pw_ref, out_ref):
    f32 = jnp.float32
    bt, c, h, w = org_ref.shape
    _, hp, wp = out_ref.shape

    # ---- channel sum of (org - enh), streamed over C (C is small & static) --
    g = org_ref[:, 0, :, :] - enh_ref[:, 0, :, :]
    for ch in range(1, c):
        g = g + (org_ref[:, ch, :, :] - enh_ref[:, ch, :, :])        # (Bt, H, W)

    # ---- AvgPool2d(2) -------------------------------------------------------
    # Width pool: ONE big MXU matmul on the flattened block.  pw already
    # carries the 0.25 pool scale and the 1/C channel-mean scale.
    gw = jnp.dot(g.reshape(bt * h, w), pw_ref[...],
                 preferred_element_type=f32).reshape(bt, h, wp)       # (Bt, H, Wp)

    # Height pool: batched MXU matmul (canonical 'bph,bhw->bpw' pattern).
    phtb = jnp.broadcast_to(pht_ref[...], (bt, hp, h))
    gp = jnp.einsum("bph,bhw->bpw", phtb, gw,
                    preferred_element_type=f32)                        # (Bt, Hp, Wp)

    # ---- batched epilogue on a single lane-dense 2-D slab -------------------
    gpf = gp.reshape(bt * hp, wp)
    # row index *within each image* (built 3-D then merged: no vector modulo).
    row = jax.lax.broadcasted_iota(jnp.int32, (bt, hp, wp), 1).reshape(bt * hp, wp)
    col = jax.lax.broadcasted_iota(jnp.int32, (bt * hp, wp), 1)

    # Zero-padded neighbors via cyclic roll (XLU) + boundary mask (VPU).  The
    # sublane rolls wrap across image boundaries in the flattened slab, but the
    # row mask zeroes exactly those positions (they correspond to zero padding).
    left_nb = jnp.where(col > 0, pltpu.roll(gpf, 1, axis=1), 0.0)
    right_nb = jnp.where(col < wp - 1, pltpu.roll(gpf, wp - 1, axis=1), 0.0)
    up_nb = jnp.where(row > 0, pltpu.roll(gpf, 1, axis=0), 0.0)
    down_nb = jnp.where(row < hp - 1, pltpu.roll(gpf, bt * hp - 1, axis=0), 0.0)

    d_l = gpf - left_nb
    d_r = gpf - right_nb
    d_u = gpf - up_nb
    d_d = gpf - down_nb
    out_ref[...] = (d_l * d_l + d_r * d_r + d_u * d_u + d_d * d_d).reshape(bt, hp, wp)


def _round_up(x, m):
    return ((x + m - 1) // m) * m


def _tpu_profile():
    """Returns (vmem_capacity_bytes, likely_two_tensorcores)."""
    cap = 64 * 1024 * 1024  # conservative default (v7x per-TC VMEM)
    try:
        cap = int(pltpu.get_tpu_info().vmem_capacity_bytes)
    except Exception:
        pass
    # v7x: 64 MiB VMEM per TensorCore, 2 TCs/chip; v5e/v6e: 128 MiB, 1 TC.
    # TODO(synk): switch to an explicit core-count query if TpuInfo exposes one.
    two_tc = cap <= 64 * 1024 * 1024
    return cap, two_tc


def _vmem_model(C, H, W):
    """Approximate per-image and fixed VMEM footprint, (8,128)-tile padded."""
    Hp, Wp = H // 2, W // 2
    hs, wl = _round_up(H, 8), _round_up(W, 128)
    hl = _round_up(H, 128)
    hps, wpl = _round_up(Hp, 8), _round_up(Wp, 128)
    per_image = 4 * (
        4 * C * hs * wl      # two inputs x two pipeline buffers
        + 3 * hs * wl        # channel-sum temporaries / reshape copies
        + 2 * hs * wpl       # width-pooled plane (+ copy)
        + hps * hl           # broadcast height-pool matrix
        + 14 * hps * wpl     # pooled plane, rolls, masks, squares, 2x out buffers
    )
    fixed = 4 * 2 * (hps * hl + _round_up(W, 8) * wpl) + (2 << 20)  # pht/pw + slack
    return per_image, fixed


def _choose_batch_tile(B, per_image_bytes, budget_bytes, two_tc):
    """Largest Bt fitting the VMEM budget; megacore-friendly step count on v7x."""
    bt = max(1, min(B, budget_bytes // max(1, per_image_bytes)))
    if two_tc and B >= 2:
        bt = min(bt, pl.cdiv(B, 2))                 # >= 2 grid steps for the 2 TCs
        # Prefer an even step count so neither core idles a whole step; only
        # search down to bt//2 so DMAs stay large.
        cand = bt
        while cand >= max(1, bt // 2):
            if pl.cdiv(B, cand) % 2 == 0:
                bt = cand
                break
            cand -= 1
    return int(bt)


def l_structure(org, enhance):
    """Pallas implementation of L_structure.forward(org, enhance)."""
    assert org.shape == enhance.shape
    B, C, H, W = org.shape
    assert H % 2 == 0 and W % 2 == 0
    Hp, Wp = H // 2, W // 2

    org = org.astype(jnp.float32)
    enhance = enhance.astype(jnp.float32)

    vmem_cap, two_tc = _tpu_profile()
    per_image, fixed = _vmem_model(C, H, W)
    budget = max(0, int(vmem_cap * 0.70) - fixed)
    Bt = _choose_batch_tile(B, per_image, budget, two_tc)
    n_steps = pl.cdiv(B, Bt)
    vmem_limit = min(int(vmem_cap * 0.85),
                     max(Bt * per_image + fixed + (4 << 20), 32 << 20))

    # Pooling matrices (constants, resident in VMEM for the whole grid).
    # pht[p, i] = 1 iff i // 2 == p ;  pw[j, q] = (0.25 / C) iff j // 2 == q.
    pht = (jnp.arange(H)[None, :] // 2 == jnp.arange(Hp)[:, None]).astype(jnp.float32)
    pw = (jnp.arange(W)[:, None] // 2 == jnp.arange(Wp)[None, :]).astype(jnp.float32)
    pw = pw * (0.25 / C)

    flops = (2 * B * C * H * W          # diff + channel accumulation
             + 2 * B * H * W * Wp       # width-pool matmul
             + 2 * B * Hp * H * Wp      # height-pool matmul
             + 12 * B * Hp * Wp)        # epilogue
    bytes_accessed = 4 * (2 * B * C * H * W + B * Hp * Wp + Hp * H + W * Wp)

    out = pl.pallas_call(
        _l_structure_kernel,
        out_shape=jax.ShapeDtypeStruct((B, 1, Hp, Wp), jnp.float32),
        grid_spec=pltpu.PrefetchScalarGridSpec(
            num_scalar_prefetch=0,
            grid=(n_steps,),
            in_specs=[
                pl.BlockSpec((Bt, C, H, W), lambda i: (i, 0, 0, 0)),
                pl.BlockSpec((Bt, C, H, W), lambda i: (i, 0, 0, 0)),
                pl.BlockSpec((Hp, H), lambda i: (0, 0)),   # constant, resident
                pl.BlockSpec((W, Wp), lambda i: (0, 0)),   # constant, resident
            ],
            out_specs=pl.BlockSpec((Bt, None, Hp, Wp), lambda i: (i, 0, 0, 0)),
        ),
        compiler_params=pltpu.CompilerParams(
            dimension_semantics=("parallel",),
            vmem_limit_bytes=int(vmem_limit),
        ),
        cost_estimate=pl.CostEstimate(
            flops=flops, transcendentals=0, bytes_accessed=bytes_accessed),
    )(org, enhance, pht, pw)
    return out


def _reference(org, enh):
    """Pure-JAX mirror of the PyTorch forward for verification."""
    om = org.mean(axis=1, keepdims=True)
    em = enh.mean(axis=1, keepdims=True)

    def pool(x):
        b, c, h, w = x.shape
        return x.reshape(b, c, h // 2, 2, w // 2, 2).mean(axis=(3, 5))

    op, ep = pool(om), pool(em)

    def neighbor(x, dy, dx):
        p = jnp.pad(x, ((0, 0), (0, 0), (1, 1), (1, 1)))
        h, w = x.shape[2], x.shape[3]
        return p[:, :, 1 + dy:1 + dy + h, 1 + dx:1 + dx + w]

    total = jnp.zeros_like(op)
    for dy, dx in ((0, -1), (0, 1), (-1, 0), (1, 0)):  # left, right, up, down
        d_org = op - neighbor(op, dy, dx)
        d_enh = ep - neighbor(ep, dy, dx)
        total = total + (d_org - d_enh) ** 2
    return total


if __name__ == "__main__":
    key = jax.random.PRNGKey(0)
    k1, k2 = jax.random.split(key)
    org = jax.random.uniform(k1, (2, 4, 16, 16), dtype=jnp.float32)
    enhance = jax.random.uniform(k2, (2, 4, 16, 16), dtype=jnp.float32)

    out = l_structure(org, enhance)
    jax.block_until_ready(out)

    ref = _reference(org, enhance)
    assert out.shape == (2, 1, 8, 8), out.shape
    assert jnp.allclose(out, ref, atol=1e-5, rtol=1e-5), "mismatch vs reference"

    print("KERNEL_OK")
</pallas_src>

<mosaic_0001>
module attributes {stable_mosaic.version = 11 : i64} {
  func.func @_l_structure_kernel(%arg0: i32, %arg1: memref<1x4x16x16xf32, #tpu.memory_space<vmem>>, %arg2: memref<1x4x16x16xf32, #tpu.memory_space<vmem>>, %arg3: memref<8x16xf32, #tpu.memory_space<vmem>>, %arg4: memref<16x8xf32, #tpu.memory_space<vmem>>, %arg5: memref<1x1x8x8xf32, #tpu.memory_space<vmem>>) attributes {dimension_semantics = [#tpu.dimension_semantics<parallel>], iteration_bounds = array<i64: 2>, scalar_prefetch = 0 : i64, scratch_operands = 0 : i64, tpu.core_type = #tpu.core_type<tc>, window_params = [{transform_indices = @transform_0, window_bounds = array<i64: 1, 4, 16, 16>}, {transform_indices = @transform_1, window_bounds = array<i64: 1, 4, 16, 16>}, {pipeline_mode = #tpu.pipeline_mode<synchronous>, transform_indices = @transform_2, window_bounds = array<i64: 8, 16>}, {pipeline_mode = #tpu.pipeline_mode<synchronous>, transform_indices = @transform_3, window_bounds = array<i64: 16, 8>}, {transform_indices = @transform_4, window_bounds = array<i64: 1, 1, 8, 8>}]} {
    %c0 = arith.constant 0 : index
    %c0_0 = arith.constant 0 : index
    %c0_1 = arith.constant 0 : index
    %c0_2 = arith.constant 0 : index
    %0 = vector.load %arg1[%c0, %c0_0, %c0_1, %c0_2] : memref<1x4x16x16xf32, #tpu.memory_space<vmem>>, vector<1x1x16x16xf32>
    %1 = vector.shape_cast %0 : vector<1x1x16x16xf32> to vector<1x16x16xf32>
    %c0_3 = arith.constant 0 : index
    %c0_4 = arith.constant 0 : index
    %c0_5 = arith.constant 0 : index
    %c0_6 = arith.constant 0 : index
    %2 = vector.load %arg2[%c0_3, %c0_4, %c0_5, %c0_6] : memref<1x4x16x16xf32, #tpu.memory_space<vmem>>, vector<1x1x16x16xf32>
    %3 = vector.shape_cast %2 : vector<1x1x16x16xf32> to vector<1x16x16xf32>
    %4 = arith.subf %1, %3 : vector<1x16x16xf32>
    %c0_7 = arith.constant 0 : index
    %c1 = arith.constant 1 : index
    %c0_8 = arith.constant 0 : index
    %c0_9 = arith.constant 0 : index
    %5 = vector.load %arg1[%c0_7, %c1, %c0_8, %c0_9] : memref<1x4x16x16xf32, #tpu.memory_space<vmem>>, vector<1x1x16x16xf32>
    %6 = vector.shape_cast %5 : vector<1x1x16x16xf32> to vector<1x16x16xf32>
    %c0_10 = arith.constant 0 : index
    %c1_11 = arith.constant 1 : index
    %c0_12 = arith.constant 0 : index
    %c0_13 = arith.constant 0 : index
    %7 = vector.load %arg2[%c0_10, %c1_11, %c0_12, %c0_13] : memref<1x4x16x16xf32, #tpu.memory_space<vmem>>, vector<1x1x16x16xf32>
    %8 = vector.shape_cast %7 : vector<1x1x16x16xf32> to vector<1x16x16xf32>
    %9 = arith.subf %6, %8 : vector<1x16x16xf32>
    %10 = arith.addf %4, %9 : vector<1x16x16xf32>
    %c0_14 = arith.constant 0 : index
    %c2 = arith.constant 2 : index
    %c0_15 = arith.constant 0 : index
    %c0_16 = arith.constant 0 : index
    %11 = vector.load %arg1[%c0_14, %c2, %c0_15, %c0_16] : memref<1x4x16x16xf32, #tpu.memory_space<vmem>>, vector<1x1x16x16xf32>
    %12 = vector.shape_cast %11 : vector<1x1x16x16xf32> to vector<1x16x16xf32>
    %c0_17 = arith.constant 0 : index
    %c2_18 = arith.constant 2 : index
    %c0_19 = arith.constant 0 : index
    %c0_20 = arith.constant 0 : index
    %13 = vector.load %arg2[%c0_17, %c2_18, %c0_19, %c0_20] : memref<1x4x16x16xf32, #tpu.memory_space<vmem>>, vector<1x1x16x16xf32>
    %14 = vector.shape_cast %13 : vector<1x1x16x16xf32> to vector<1x16x16xf32>
    %15 = arith.subf %12, %14 : vector<1x16x16xf32>
    %16 = arith.addf %10, %15 : vector<1x16x16xf32>
    %c0_21 = arith.constant 0 : index
    %c3 = arith.constant 3 : index
    %c0_22 = arith.constant 0 : index
    %c0_23 = arith.constant 0 : index
    %17 = vector.load %arg1[%c0_21, %c3, %c0_22, %c0_23] : memref<1x4x16x16xf32, #tpu.memory_space<vmem>>, vector<1x1x16x16xf32>
    %18 = vector.shape_cast %17 : vector<1x1x16x16xf32> to vector<1x16x16xf32>
    %c0_24 = arith.constant 0 : index
    %c3_25 = arith.constant 3 : index
    %c0_26 = arith.constant 0 : index
    %c0_27 = arith.constant 0 : index
    %19 = vector.load %arg2[%c0_24, %c3_25, %c0_26, %c0_27] : memref<1x4x16x16xf32, #tpu.memory_space<vmem>>, vector<1x1x16x16xf32>
    %20 = vector.shape_cast %19 : vector<1x1x16x16xf32> to vector<1x16x16xf32>
    %21 = arith.subf %18, %20 : vector<1x16x16xf32>
    %22 = arith.addf %16, %21 : vector<1x16x16xf32>
    %23 = vector.shape_cast %22 : vector<1x16x16xf32> to vector<16x16xf32>
    %c0_28 = arith.constant 0 : index
    %c0_29 = arith.constant 0 : index
    %24 = vector.load %arg4[%c0_28, %c0_29] : memref<16x8xf32, #tpu.memory_space<vmem>>, vector<16x8xf32>
    %cst = arith.constant dense<0.000000e+00> : vector<16x8xf32>
    %25 = tpu.matmul %23, %24, %cst {dimension_numbers = #tpu.dot_dimension_numbers<[1], [0], [0], [1], [0, 0, 1, 1], [], []>} : vector<16x16xf32>, vector<16x8xf32>, vector<16x8xf32> -> vector<16x8xf32>
    %26 = vector.shape_cast %25 : vector<16x8xf32> to vector<1x16x8xf32>
    %c0_30 = arith.constant 0 : index
    %c0_31 = arith.constant 0 : index
    %27 = vector.load %arg3[%c0_30, %c0_31] : memref<8x16xf32, #tpu.memory_space<vmem>>, vector<8x16xf32>
    %28 = vector.shape_cast %27 : vector<8x16xf32> to vector<1x8x16xf32>
    "tpu.trace_start"() <{level = 10 : i32, message = "bph,bhw->bpw"}> : () -> ()
    %cst_32 = arith.constant dense<0.000000e+00> : vector<1x8x8xf32>
    %29 = tpu.matmul %28, %26, %cst_32 {dimension_numbers = #tpu.dot_dimension_numbers<[2], [1], [1], [2], [0, 0, 0, 1, 1, 2], [0], [0]>} : vector<1x8x16xf32>, vector<1x16x8xf32>, vector<1x8x8xf32> -> vector<1x8x8xf32>
    "tpu.trace_stop"() : () -> ()
    %30 = vector.shape_cast %29 : vector<1x8x8xf32> to vector<8x8xf32>
    %31 = tpu.iota {dimensions = array<i32: 1>} : vector<1x8x8xi32>
    %32 = vector.shape_cast %31 : vector<1x8x8xi32> to vector<8x8xi32>
    %33 = tpu.iota {dimensions = array<i32: 1>} : vector<8x8xi32>
    %c0_i32 = arith.constant 0 : i32
    %34 = vector.broadcast %c0_i32 : i32 to vector<8x8xi32>
    %35 = arith.cmpi sgt, %33, %34 : vector<8x8xi32>
    %c1_i32 = arith.constant 1 : i32
    %36 = tpu.dynamic_rotate %30 by %c1_i32 dim 1 : vector<8x8xf32>, i32 -> vector<8x8xf32>
    %cst_33 = arith.constant 0.000000e+00 : f32
    %37 = vector.broadcast %cst_33 : f32 to vector<8x8xf32>
    %38 = arith.select %35, %36, %37 : vector<8x8xi1>, vector<8x8xf32>
    %c7_i32 = arith.constant 7 : i32
    %39 = vector.broadcast %c7_i32 : i32 to vector<8x8xi32>
    %40 = arith.cmpi slt, %33, %39 : vector<8x8xi32>
    %c7_i32_34 = arith.constant 7 : i32
    %41 = tpu.dynamic_rotate %30 by %c7_i32_34 dim 1 : vector<8x8xf32>, i32 -> vector<8x8xf32>
    %cst_35 = arith.constant 0.000000e+00 : f32
    %42 = vector.broadcast %cst_35 : f32 to vector<8x8xf32>
    %43 = arith.select %40, %41, %42 : vector<8x8xi1>, vector<8x8xf32>
    %c0_i32_36 = arith.constant 0 : i32
    %44 = vector.broadcast %c0_i32_36 : i32 to vector<8x8xi32>
    %45 = arith.cmpi sgt, %32, %44 : vector<8x8xi32>
    %c1_i32_37 = arith.constant 1 : i32
    %46 = tpu.dynamic_rotate %30 by %c1_i32_37 dim 0 : vector<8x8xf32>, i32 -> vector<8x8xf32>
    %cst_38 = arith.constant 0.000000e+00 : f32
    %47 = vector.broadcast %cst_38 : f32 to vector<8x8xf32>
    %48 = arith.select %45, %46, %47 : vector<8x8xi1>, vector<8x8xf32>
    %c7_i32_39 = arith.constant 7 : i32
    %49 = vector.broadcast %c7_i32_39 : i32 to vector<8x8xi32>
    %50 = arith.cmpi slt, %32, %49 : vector<8x8xi32>
    %c7_i32_40 = arith.constant 7 : i32
    %51 = tpu.dynamic_rotate %30 by %c7_i32_40 dim 0 : vector<8x8xf32>, i32 -> vector<8x8xf32>
    %cst_41 = arith.constant 0.000000e+00 : f32
    %52 = vector.broadcast %cst_41 : f32 to vector<8x8xf32>
    %53 = arith.select %50, %51, %52 : vector<8x8xi1>, vector<8x8xf32>
    %54 = arith.subf %30, %38 : vector<8x8xf32>
    %55 = arith.subf %30, %43 : vector<8x8xf32>
    %56 = arith.subf %30, %48 : vector<8x8xf32>
    %57 = arith.subf %30, %53 : vector<8x8xf32>
    %58 = arith.mulf %54, %54 : vector<8x8xf32>
    %59 = arith.mulf %55, %55 : vector<8x8xf32>
    %60 = arith.addf %58, %59 : vector<8x8xf32>
    %61 = arith.mulf %56, %56 : vector<8x8xf32>
    %62 = arith.addf %60, %61 : vector<8x8xf32>
    %63 = arith.mulf %57, %57 : vector<8x8xf32>
    %64 = arith.addf %62, %63 : vector<8x8xf32>
    %65 = vector.shape_cast %64 : vector<8x8xf32> to vector<1x8x8xf32>
    %c0_42 = arith.constant 0 : index
    %c0_43 = arith.constant 0 : index
    %c0_44 = arith.constant 0 : index
    %c0_45 = arith.constant 0 : index
    %66 = vector.load %arg5[%c0_42, %c0_43, %c0_44, %c0_45] : memref<1x1x8x8xf32, #tpu.memory_space<vmem>>, vector<1x1x8x8xf32>
    %67 = vector.shape_cast %66 : vector<1x1x8x8xf32> to vector<1x8x8xf32>
    %68 = vector.shape_cast %65 : vector<1x8x8xf32> to vector<1x1x8x8xf32>
    tpu.vector_store %arg5[%c0_42, %c0_43, %c0_44, %c0_45], %68 {strides = array<i32>} : memref<1x1x8x8xf32, #tpu.memory_space<vmem>>, vector<1x1x8x8xf32>,
    return
  }
  func.func @transform_0(%arg0: i32) -> (i32, i32, i32, i32) {
    %c0_i32 = arith.constant 0 : i32
    %c0_i32_0 = arith.constant 0 : i32
    %c0_i32_1 = arith.constant 0 : i32
    %c0_i32_2 = arith.constant 0 : i32
    return %arg0, %c0_i32, %c0_i32_0, %c0_i32_1 : i32, i32, i32, i32
  }
  func.func @transform_1(%arg0: i32) -> (i32, i32, i32, i32) {
    %c0_i32 = arith.constant 0 : i32
    %c0_i32_0 = arith.constant 0 : i32
    %c0_i32_1 = arith.constant 0 : i32
    %c0_i32_2 = arith.constant 0 : i32
    return %arg0, %c0_i32, %c0_i32_0, %c0_i32_1 : i32, i32, i32, i32
  }
  func.func @transform_2(%arg0: i32) -> (i32, i32) {
    %c0_i32 = arith.constant 0 : i32
    %c0_i32_0 = arith.constant 0 : i32
    %c0_i32_1 = arith.constant 0 : i32
    return %c0_i32, %c0_i32_0 : i32, i32
  }
  func.func @transform_3(%arg0: i32) -> (i32, i32) {
    %c0_i32 = arith.constant 0 : i32
    %c0_i32_0 = arith.constant 0 : i32
    %c0_i32_1 = arith.constant 0 : i32
    return %c0_i32, %c0_i32_0 : i32, i32
  }
  func.func @transform_4(%arg0: i32) -> (i32, i32, i32, i32) {
    %c0_i32 = arith.constant 0 : i32
    %c0_i32_0 = arith.constant 0 : i32
    %c0_i32_1 = arith.constant 0 : i32
    %c0_i32_2 = arith.constant 0 : i32
    return %arg0, %c0_i32, %c0_i32_0, %c0_i32_1 : i32, i32, i32, i32
  }
}

</mosaic_0001>

<bundles_post_ra>
// kernel: tpu_custom_call.1
= control target key start
LH: loop header
LB: loop body
LE: loop exit
PB: predicated region body
PF: predicated region fallthrough
CT: control target
= control target key end

     0   :  { %9 = vsyncpa [#allocation3], 0  ;;  %s1141_s0 = inlined_call_operand.hbm [shape: f32[2,4,16,16], index: 0, kind: input, shape index: {}]   ;;  %s1142_s1 = inlined_call_operand.hbm [shape: f32[2,4,16,16], index: 1, kind: input, shape index: {}]   ;;  %s1143_s2 = inlined_call_operand.vmem [shape: f32[8,16], index: 2, kind: input, shape index: {}]   ;;  %s1144_s3 = inlined_call_operand.vmem [shape: f32[16,8], index: 3, kind: input, shape index: {}]   ;;  %s1145_s4 = inlined_call_operand.hbm [shape: f32[2,1,8,8], index: 4, kind: output, shape index: {}]  }
   0x1   :  { %11 = vsyncpa [#allocation3 + $0x1], 0 }
   0x2   :  { %12 = vsyncpa [#allocation6], 0 }
   0x3   :  { %14 = vsyncpa [#allocation6 + $0x1], 0 }
   0x4   :  { %15 = vsyncpa [#allocation4], 0 }
   0x5   :  { %17 = vsyncpa [#allocation4 + $0x1], 0  ;;  %s887_s15 = smov 0   ;;  %s889_s16 = smov 0  }
   0x6   :  { %s891_s17 = smov 0   ;;  %s893_s18 = smov 0  }
   0x7 LB: > { %s908_s19 = sadd.s32 4294967295, %s849_s18   ;;  %s598_s20 = sadd.s32 4294967294, %s849_s18   ;;  %s849_s18 = sphi %s893_s18, %s1161_s18   ;;  %s845_s17 = sphi %s891_s17, %s1160_s17   ;;  %s841_s16 = sphi %s889_s16, %s1159_s16   ;;  %s837_s15 = sphi %s887_s15, %s1158_s15  }
   0x8   : > { %s912_s21 = sadd.s32 1, %s849_s18   ;;  %s30_s22 = sadd.s32 1, %s845_s17 }
   0x9   : > { %s27_s23 = ssub.s32 %s849_s18, %s912_s21  ;;  %p37_p0 = scmp.ne.s32.totalorder %s845_s17, %s841_s16 }
   0xa   : > { %p28_p1 = scmp.eq.s32.totalorder %s27_s23, 0  ;;  %p38_p2 = scmp.eq.s32.totalorder %s849_s18, 0 }
   0xb   : > { %p43_p3 = scmp.ne.s32.totalorder %s841_s16, %s837_s15  ;;  %p44_p4 = scmp.eq.s32.totalorder %s908_s19, 0 }
   0xc   : > { %s924_s24 = scalar_select %p28_p1, %s845_s17, %s30_s22  }
   0xd   : > { %p926_p5 = por %p38_p2, %p37_p0  ;;  %p930_p6 = por %p44_p4, %p43_p3 }
   0xe   : > { %p135_p7 = scmp.eq.s32.totalorder %s908_s19, 1  ;;  %p141_p8 = scmp.eq.s32.totalorder %s598_s20, 1 }
   0xf   : > { %s1149_s26 = scalar_select %p930_p6, 1, 0 }
  0x10   : > { %p677_p10 = scmp.lt.s32.totalorder %s849_s18, 2  ;;  %p937_p11 = por %p135_p7, %p37_p0 }
  0x11   : > { %p941_p12 = por %p141_p8, %p43_p3  ;;  %s946_s29 = sand.u32 1, %s845_s17  }
  0x12   : > { %s1150_s27 = scalar_select %p937_p11, 1, 0 }
  0x13   : > { %s1151_s28 = scalar_select %p941_p12, 1, 0 }
  0x14   : > { %s630_s30 = sshll.u32 %s849_s18, 10  ;;  %s601_s5 = sshll.u32 %s946_s29, 6 }
  0x15   : > { %s955_s8 = scalar_lea.hbm %s1141_s0, %s630_s30  ;;  %s171_s9 = scalar_lea.vmem [#allocation2], %s601_s5 }
  0x16   : > { %s178_s10 = sshll.u32 %s171_s9, 4  ;;  %p961_p13 = pnand %p677_p10, %p926_p5  ;;  %s965_s10 = int_to_ptr.vmem [resolvable:$true] %s178_s10 }
  0x17   : > { %s168_s12 = scalar_lea.sflag [#allocation3], %s946_s29  ;;  %s719_s13 = scalar_lea.hbm %s955_s8, 1024 }
  0x18   : > { %p720_p0 = scmp.ne.s32.totalorder %s955_s8, %s719_s13  ;;  %p721_p1 = pneg %p961_p13 }
  0x19   : > { %s724_s22 = scalar_lea.hbm %s1141_s0, 2048  ;;  %p725_p4 = scmp.lt.u32.totalorder %s955_s8, %s1141_s0 }
  0x1a   : > { %p722_p2 = pnand %p721_p1, %p720_p0  ;;  %p726_p5 = scmp.lt.u32.totalorder %s724_s22, %s719_s13 }
  0x1b   : > { %p728_p8 = scmp.lt.u32.totalorder %s719_s13, %s955_s8 }
  0x1c   : > { %p723_p3 = pneg %p722_p2  ;;  %p727_p7 = por %p726_p5, %p725_p4 }
  0x1e   : > { %p729_p10 = por %p728_p8, %p727_p7 }
  0x20   : > { %p730_p9 = pnand %p729_p10, %p723_p3 }
  0x22   : > { %733 = shalt.err (!%p730_p9)
}
  0x23   : > { %s734_s6 = scalar_lea.vmem %s965_s10, 1024  ;;  %s851_s7 = smov [#allocation2]  }
  0x24   : > { %p735_p0 = scmp.ne.s32.totalorder %s965_s10, %s734_s6  ;;  %s739_s9 = sshll.u32 %s851_s7, 4  ;;  %s740_s9 = int_to_ptr.vmem [resolvable:$false] %s739_s9 }
  0x25   : > { %s741_s14 = scalar_lea.vmem %s740_s9, 2048  ;;  %p742_p11 = scmp.lt.s32.totalorder %s965_s10, %s740_s9 }
  0x26   : > { %p737_p2 = pnand %p735_p0, %p721_p1  ;;  %p743_p4 = scmp.lt.s32.totalorder %s741_s14, %s734_s6 }
  0x28   : > { %p738_p12 = pneg %p737_p2  ;;  %p744_p5 = por %p743_p4, %p742_p11 }
  0x2a   : > { %p745_p7 = pnand %p744_p5, %p738_p12 }
  0x2c   : > { %748 = shalt.err (!%p745_p7)
}
  0x2d   : > { %s852_s13 = smov 128   ;;  %s853_s20 = smov 8  }
  0x2e   : > { %669 = dma.hbm_to_vmem [thread:$0]  (!%p961_p13), %s955_s8, 1024, %s965_s10, %s168_s12, %s852_s13, %s852_s13, %s853_s20  }
  0x2f   : > { %p607_p9 = scmp.ge.s32.totalorder %s849_s18, 1  ;;  %p207_p11 = scmp.lt.s32.totalorder %s849_s18, 3 }
  0x30   : > { %s1009_s6 = scalar_lea.hbm %s1142_s1, %s630_s30  ;;  %s192_s7 = scalar_lea.vmem [#allocation5], %s601_s5 }
  0x31   : > { %p1000_p12 = pnand %p607_p9, %p207_p11  ;;  %s199_s9 = sshll.u32 %s192_s7, 4  ;;  %s1013_s9 = int_to_ptr.vmem [resolvable:$true] %s199_s9 }
  0x32   : > { %s189_s8 = scalar_lea.sflag [#allocation6], %s946_s29  ;;  %s749_s10 = scalar_lea.hbm %s1009_s6, 1024 }
  0x33   : > { %p750_p3 = scmp.ne.s32.totalorder %s1009_s6, %s749_s10  ;;  %s754_s30 = scalar_lea.hbm %s1142_s1, 2048 }
  0x34   : > { %p755_p0 = scmp.lt.u32.totalorder %s1009_s6, %s1142_s1  ;;  %p756_p2 = scmp.lt.u32.totalorder %s754_s30, %s749_s10 }
  0x35   : > { %p752_p8 = pnand %p750_p3, %p721_p1  ;;  %p758_p5 = scmp.lt.u32.totalorder %s749_s10, %s1009_s6 }
  0x36   : > { %p757_p4 = por %p756_p2, %p755_p0 }
  0x37   : > { %p753_p10 = pneg %p752_p8 }
  0x38   : > { %p759_p7 = por %p758_p5, %p757_p4 }
  0x3a   : > { %p760_p9 = pnand %p759_p7, %p753_p10 }
  0x3c   : > { %763 = shalt.err (!%p760_p9)
}
  0x3d   : > { %s764_s5 = scalar_lea.vmem %s1013_s9, 1024  ;;  %s854_s7 = smov [#allocation5]  }
  0x3e   : > { %p765_p11 = scmp.ne.s32.totalorder %s1013_s9, %s764_s5  ;;  %s769_s12 = sshll.u32 %s854_s7, 4  ;;  %s770_s12 = int_to_ptr.vmem [resolvable:$false] %s769_s12 }
  0x3f   : > { %s771_s14 = scalar_lea.vmem %s770_s12, 2048  ;;  %p772_p6 = scmp.lt.s32.totalorder %s1013_s9, %s770_s12 }
  0x40   : > { %p767_p3 = pnand %p765_p11, %p721_p1  ;;  %p773_p0 = scmp.lt.s32.totalorder %s771_s14, %s764_s5 }
  0x42   : > { %p768_p8 = pneg %p767_p3  ;;  %p774_p2 = por %p773_p0, %p772_p6 }
  0x44   : > { %p775_p4 = pnand %p774_p2, %p768_p8 }
  0x46   : > { %778 = shalt.err (!%p775_p4)
}
  0x47   : > { %672 = dma.hbm_to_vmem [thread:$0]  (!%p961_p13), %s1009_s6, 1024, %s1013_s9, %s189_s8, %s852_s13, %s852_s13, %s853_s20  }
  0x48   : > { %211 = sbr.rel (%p1000_p12) target bundleno = 901 (0x385), region = 36  ;;  %s1047_s10 = sand.u32 (!%p1000_p12), 1, %s841_s16  }
  0x49   : > { %s608_s30 = sshll.u32 (!%p1000_p12), %s1047_s10, 6  ;;  %s214_s23 = scalar_lea.sflag (!%p1000_p12), [#allocation3], %s1047_s10 }
  0x4a   : > { %s1051_s11 = scalar_lea.vmem (!%p1000_p12), [#allocation2], %s608_s30  ;;  %p1154_p6 = scmp.ne.s32.totalorder (!%p1000_p12), %s1149_s26, 0 }
  0x4f   : > { %824 = dma.done.wait (%p1154_p6), %s214_s23, 1024  }
  0x50   : > { %826 = vsyncadd (%p1154_p6), %s214_s23, 4294966272  ;;  %s223_s29 = scalar_lea.sflag [#allocation6], %s1047_s10  ;;  %s1058_s13 = scalar_lea.vmem [#allocation5], %s608_s30 }
  0x51   : > { %828 = dma.done.wait (%p1154_p6), %s223_s29, 1024  }
  0x52   : > { %830 = vsyncadd (%p1154_p6), %s223_s29, 4294966272  ;;  %v292_v0 = vld [vmem:[%s1144_s3] sm:$0xff]  ;;  %v293_v1 = vld [vmem:[%s1144_s3 + $0x8] sm:$0xff]  ;;  %vm294_vm0 = vcmask 130048   ;;  %v855_v33 = vmov 0.0|0.0   ;;  %vm856_vm1 = vmmov 0   ;;  %v450_v45 = vlaneseq }
  0x53   : > { %v256_v2 = vld [vmem:[%s1051_s11] sm:$0xff]  ;;  %v653_v3 = vpack.c.bf16 %v293_v1, %v292_v0  ;;  %v611_v5 = vld [vmem:[%s1051_s11 + $0x10] sm:$0xff]  ;;  %v257_v14 = vld [vmem:[%s1051_s11 + $0x8] sm:$0xff]  ;;  %657 = vmatprep.subr.bf16.mxu1 %v855_v33  ;;  %v857_v34 = vmov 0.0   ;;  %s858_s25 = smov 8   ;;  %vm455_vm2 = vcmask 1047616  }
  0x54   : > { %v258_v4 = vld [vmem:[%s1058_s13] sm:$0xff]  ;;  %v613_v6 = vld [vmem:[%s1058_s13 + $0x10] sm:$0xff]  ;;  %v259_v15 = vld [vmem:[%s1058_s13 + $0x8] sm:$0xff]  ;;  %650 = vmatprep.mubr.msk.f32.mxu1 %vm856_vm1, %v857_v34  ;;  %s859_s5 = smov 121   ;;  %s860_s7 = smov 127   ;;  %v453_v46 = vand.u32 127, %v450_v45 }
  0x55   : > { %v260_v7 = vsub.f32 %v256_v2, %v258_v4  ;;  %v268_v8 = vsub.f32 %v611_v5, %v613_v6  ;;  %v615_v9 = vld [vmem:[%s1051_s11 + $0x20] sm:$0xff]  ;;  %v619_v11 = vld [vmem:[%s1051_s11 + $0x30] sm:$0xff]  ;;  %654 = vmatprep.subr.bf16.mxu0 %v653_v3  ;;  %v261_v18 = vsub.f32 %v257_v14, %v259_v15  ;;  %v612_v19 = vld [vmem:[%s1051_s11 + $0x18] sm:$0xff]  ;;  %v451_v47 = vshrl.u32 %v450_v45, 7  ;;  %s610_s12 = sshll.u32 %s1047_s10, 3  ;;  %s627_s14 = sshll.u32 %s908_s19, 7 }
  0x56   : > { %v617_v10 = vld [vmem:[%s1058_s13 + $0x20] sm:$0xff]  ;;  %v621_v13 = vld [vmem:[%s1058_s13 + $0x30] sm:$0xff]  ;;  %656 = vmatpush3.bf16.msra.mxu0 %v653_v3  ;;  %v614_v20 = vld [vmem:[%s1058_s13 + $0x18] sm:$0xff]  ;;  %vm454_vm3 = vcmp.gt.s32.totalorder %v453_v46, 0  ;;  %vm467_vm6 = vcmp.lt.s32.totalorder %v453_v46, 7  ;;  %s255_s30 = scalar_lea.vmem [#allocation7], %s610_s12 }
  0x57   : > { %v278_v12 = vsub.f32 %v615_v9, %v617_v10  ;;  %v270_v16 = vadd.f32 %v268_v8, %v260_v7  ;;  %v288_v17 = vsub.f32 %v619_v11, %v621_v13  ;;  %v616_v21 = vld [vmem:[%s1051_s11 + $0x28] sm:$0xff]  ;;  %v269_v22 = vsub.f32 %v612_v19, %v614_v20  ;;  %v620_v24 = vld [vmem:[%s1051_s11 + $0x38] sm:$0xff]  ;;  %v376_v38 = vld [vmem:[%s1143_s2] sm:$0xff]  ;;  %s505_s23 = sshll.u32 %s255_s30, 4  ;;  %s492_s20 = scalar_lea.sflag [#allocation4], %s1047_s10  ;;  %s1099_s23 = int_to_ptr.vmem [resolvable:$true] %s505_s23 }
  0x58   : > { %v618_v23 = vld [vmem:[%s1058_s13 + $0x28] sm:$0xff]  ;;  %v622_v25 = vld [vmem:[%s1058_s13 + $0x38] sm:$0xff]  ;;  %vm472_vm4 = vcmp.gt.s32.totalorder %v451_v47, 0  ;;  %vm475_vm5 = vcmp.lt.s32.totalorder %v451_v47, 7  ;;  %vm489_vm7 = vcmask 64512   ;;  %s1097_s13 = scalar_lea.hbm %s1145_s4, %s627_s14  ;;  %s779_s22 = scalar_lea.vmem %s1099_s23, 128 }
  0x59   : > { %v280_v26 = vadd.f32 %v278_v12, %v270_v16  ;;  %v279_v27 = vsub.f32 %v616_v21, %v618_v23  ;;  %v271_v28 = vadd.f32 %v269_v22, %v261_v18  ;;  %v289_v29 = vsub.f32 %v620_v24, %v622_v25  ;;  %p780_p13 = scmp.ne.s32.totalorder %s1099_s23, %s779_s22  ;;  %p1155_p1 = scmp.ne.s32.totalorder %s1150_s27, 0 }
  0x5a   : > { %s861_s19 = smov [#allocation7]  }
  0x5b   : > { %v290_v30 = vadd.f32 %v288_v17, %v280_v26  ;;  %v281_v31 = vadd.f32 %v279_v27, %v271_v28  ;;  %p781_p12 = pnand %p780_p13, %p1155_p1  ;;  %s783_s6 = sshll.u32 %s861_s19, 4  ;;  %s784_s6 = int_to_ptr.vmem [resolvable:$false] %s783_s6 }
  0x5c   : > { %s785_s9 = scalar_lea.vmem %s784_s6, 256  ;;  %p786_p5 = scmp.lt.s32.totalorder %s1099_s23, %s784_s6 }
  0x5d   : > { %643 = vmatprep.mubr.msk.f32.mxu0 %vm294_vm0, %v290_v30  ;;  %v291_v32 = vadd.f32 %v289_v29, %v281_v31  ;;  %p782_p10 = pneg %p781_p12  ;;  %p787_p7 = scmp.lt.s32.totalorder %s785_s9, %s779_s22 }
  0x5f   : > { %644 = vmatmul.mubr.msk.f32.vlgmr.msra.gmra.mrb[0].mxu0 %vm294_vm0, %v291_v32  ;;  %p788_p9 = por %p787_p7, %p786_p5 }
  0x61   : > { %p789_p11 = pnand %p788_p9, %p782_p10 }
 0x132   : > { %v645_v35 = vpop.f32.mrb[0].mxu0 }
 0x133   : > { %v367_v36 = vpop.f32.mrb[1].mxu0 }
 0x134   : > { %v658_v37 = vpack.c.bf16 %v645_v35, %v367_v36 }
 0x136   : > { %659 = vmatpush3.bf16.msra.mxu1 %v658_v37 }
 0x139   : > { %651 = vmatmul.mubr.msk.f32.vlgmr.msra.gmra.mrb[0].mxu1 %vm294_vm0, %v376_v38 }
 0x20c   : > { %v446_v39 = vpop.f32.mrb[0].mxu1 }
 0x20d   : > { %456 = vrot.lane.b32.xlu0 %v446_v39, %s858_s25  ;;  %v652_v40 = vpop.f32.mrb[1].mxu1  ;;  %v473_v48 = vrot.slane %v446_v39, 7  ;;  %v476_v51 = vrot.slane %v446_v39, 1 }
 0x20f   : > { %v474_v52 = vsel %vm472_vm4, %v473_v48, 0.0  ;;  %v477_v55 = vsel %vm475_vm5, %v476_v51, 0.0 }
 0x210   : > { %v480_v58 = vsub.f32 %v446_v39, %v474_v52  ;;  %v481_v60 = vsub.f32 %v446_v39, %v477_v55 }
 0x212   : > { %v485_v63 = vmul.f32 %v480_v58, %v480_v58  ;;  %v487_v1 = vmul.f32 %v481_v60, %v481_v60 }
 0x27f   : > { %v457_v41 = vpop.permute.xlu0 %456 }
 0x280   : > { %v458_v42 = vsel %vm455_vm2, %v457_v41, %v446_v39 }
 0x281   : > { %459 = vrot.lane.b32.xlu0 %v458_v42, %s858_s25 }
 0x2f3   : > { %v460_v43 = vpop.permute.xlu0 %459 }
 0x2f4   : > { %v461_v44 = vsel %vm455_vm2, %v460_v43, %v446_v39 }
 0x2f5   : > { %463 = vrot.lane.b32.xlu1 %v461_v44, %s859_s5 }
 0x2f9   : > { %468 = vrot.lane.b32.xlu1 %v461_v44, %s860_s7 }
 0x367   : > { %v464_v49 = vpop.permute.xlu1 %463 }
 0x368   : > { %v466_v50 = vsel %vm454_vm3, %v464_v49, 0.0 }
 0x369   : > { %v478_v53 = vsub.f32 %v446_v39, %v466_v50 }
 0x36b   : > { %v469_v54 = vpop.permute.xlu1 %468  ;;  %v482_v59 = vmul.f32 %v478_v53, %v478_v53 }
 0x36c   : > { %v471_v56 = vsel %vm467_vm6, %v469_v54, 0.0 }
 0x36d   : > { %v479_v57 = vsub.f32 %v446_v39, %v471_v56 }
 0x36f   : > { %v483_v61 = vmul.f32 %v479_v57, %v479_v57 }
 0x371   : > { %v484_v62 = vadd.f32 %v483_v61, %v482_v59 }
 0x373   : > { %v486_v0 = vadd.f32 %v485_v63, %v484_v62 }
 0x375   : > { %v488_v2 = vadd.f32 %v487_v1, %v486_v0 }
 0x377   : > { %490 = vst.msk [vmem:[%s255_s30] sm:$0xff] %vm489_vm7, %v488_v2 }
 0x378   : > { %792 = shalt.err (!%p789_p11)
}
 0x379   : > { %s793_s10 = scalar_lea.hbm %s1097_s13, 128  ;;  %s797_s25 = scalar_lea.hbm %s1145_s4, 256 }
 0x37a   : > { %p794_p3 = scmp.ne.s32.totalorder %s1097_s13, %s793_s10  ;;  %p798_p2 = scmp.lt.u32.totalorder %s1097_s13, %s1145_s4 }
 0x37b   : > { %p799_p4 = scmp.lt.u32.totalorder %s797_s25, %s793_s10  ;;  %p801_p13 = scmp.lt.u32.totalorder %s793_s10, %s1097_s13 }
 0x37c   : > { %p795_p8 = pnand %p794_p3, %p1155_p1 }
 0x37d   : > { %p800_p6 = por %p799_p4, %p798_p2 }
 0x37e   : > { %p796_p0 = pneg %p795_p8 }
 0x37f   : > { %p802_p12 = por %p801_p13, %p800_p6 }
 0x381   : > { %p803_p10 = pnand %p802_p12, %p796_p0 }
 0x383   : > { %806 = shalt.err (!%p803_p10)
}
 0x384   : > { %664 = dma.vmem_to_hbm [thread:$0]  (%p1155_p1), %s1099_s23, 128, %s1097_s13, %s492_s20  }
 0x385 PF: > { %s517_s12 = sand.u32 1, %s837_s15   ;;  %p1156_p5 = scmp.ne.s32.totalorder %s1151_s28, 0 }
 0x386   : > { %p1157_p7 = scmp.ge.s32.totalorder %s849_s18, 2  ;;  %s518_s14 = scalar_lea.sflag [#allocation4], %s517_s12 }
 0x388   : > { %p674_p9 = pnand %p1157_p7, %p1156_p5 }
 0x38a   : > { %832 = dma.done.wait (!%p674_p9), %s518_s14, 128  }
 0x38b   : > { %834 = vsyncadd (!%p674_p9), %s518_s14, 4294967168  ;;  %p20_p11 = scmp.ge.s32.totalorder %s912_s21, 4   ;;  %s1158_s15 = smov %s841_s16 }
 0x38c   : > { %s1159_s16 = smov %s845_s17  ;;  %s1160_s17 = smov %s924_s24 }
 0x38d   : > { %s1161_s18 = smov %s912_s21  ;;  %22 = sbr.rel (!%p20_p11) target bundleno = 7 (0x7), region = 100 }
 0x394   :  { %523 = vsyncpa [#allocation3], 1 }
 0x395   :  { %525 = vsyncpa [#allocation3 + $0x1], 1 }
 0x396   :  { %526 = vsyncpa [#allocation6], 1 }
 0x397   :  { %528 = vsyncpa [#allocation6 + $0x1], 1 }
 0x398   :  { %529 = vsyncpa [#allocation4], 1 }
 0x399   :  { %531 = vsyncpa [#allocation4 + $0x1], 1 }

</bundles_post_ra>
